<compile_context>
chip_gen: v6e
topology: v6e:2x2x1
jax: 0.10.0
libtpu: 0.0.40
codegen_flags: <defaults>
</compile_context>

<pallas_src>
import functools

import numpy as np
import jax
import jax.numpy as jnp
from jax.experimental import pallas as pl
from jax.experimental.pallas import tpu as pltpu


def make_fused_weight(wk, wq, wv, dtype=jnp.bfloat16):
    """Build the fused projection weight ONCE at parameter-initialization time.

    Columns are head-major: [K_r | Q_r | V_r] contiguous per head r, so the
    kernel slices one contiguous (2*dk+dv)-lane chunk per head.  Stored bf16:
    it is fed straight to the MXU (f32 accumulation), halving resident-weight
    VMEM / HBM traffic.
    """
    Nr, df, dk = wk.shape
    dv = wv.shape[2]
    w = jnp.concatenate([wk, wq, wv], axis=2)              # (Nr, df, 2*dk+dv)
    w = jnp.transpose(w, (1, 0, 2)).reshape(df, Nr * (2 * dk + dv))
    return w.astype(dtype)


def relation_module_kernel(f_a_ref, wfused_ref, wfix_ref, out_ref, *,
                           n_relations, dk, dv):
    # f_a_ref:    (TB, N, df)             f32 block of batch elements
    # wfused_ref: (df, Nr*(2*dk+dv))      bf16, head-major [K_r|Q_r|V_r] columns
    # wfix_ref:   (Nr, N, N)              f32
    # out_ref:    (TB, N, df)             f32
    Nr = n_relations
    TB, N, df = f_a_ref.shape
    C = 2 * dk + dv                                        # per-head column chunk

    f_a = f_a_ref[...]                                     # (TB, N, df) f32

    # One fused, lane-dense MXU projection for all heads' K/Q/V.
    # bf16 operands (native MXU dtype), f32 accumulation.
    f_flat = f_a.reshape(TB * N, df).astype(jnp.bfloat16)
    proj = jnp.dot(f_flat, wfused_ref[...],
                   preferred_element_type=jnp.float32)     # (TB*N, Nr*C) f32
    proj = proj.reshape(TB, N, Nr * C)

    # eye(N) mask, built once per program.
    row = jax.lax.broadcasted_iota(jnp.int32, (N, N), 0)
    col = jax.lax.broadcasted_iota(jnp.int32, (N, N), 1)
    diag = (row == col)[None]                              # (1, N, N) -> bcast over TB

    scale = jnp.float32(1.0 / np.sqrt(dk))
    wfix = wfix_ref[...]                                   # (Nr, N, N) f32

    head_outs = []
    for r in range(Nr):                                    # Nr static & tiny -> unrolled
        chunk = proj[:, :, r * C:(r + 1) * C]              # one contiguous chunk / head
        k = chunk[:, :, 0:dk]                              # (TB, N, dk)
        q = chunk[:, :, dk:2 * dk]                         # (TB, N, dk)
        v = chunk[:, :, 2 * dk:]                           # (TB, N, dv)

        # scaled_dot[b, m, n] = <k_bm, q_bn> / sqrt(dk); bf16 MXU feed, f32 acc.
        s = jnp.einsum("bmd,bnd->bmn",
                       k.astype(jnp.bfloat16), q.astype(jnp.bfloat16),
                       preferred_element_type=jnp.float32) * scale    # (TB, N, N)
        # masked_fill_(eye, 0) BEFORE softmax (zeros participate in the softmax)
        s = jnp.where(diag, 0.0, s)

        # numerically-stable softmax — all elementwise math kept in f32;
        # denominator via the EUP approximate reciprocal (separate slot, ~free).
        s = s - jnp.max(s, axis=-1, keepdims=True)
        e = jnp.exp(s)
        w_mn = e * pl.reciprocal(jnp.sum(e, axis=-1, keepdims=True), approx=True)

        # add learnable w_fix, then zero the diagonal again
        w_mn = w_mn + wfix[r][None]
        w_mn = jnp.where(diag, 0.0, w_mn)

        head_outs.append(
            jnp.einsum("bmn,bnd->bmd",
                       w_mn.astype(jnp.bfloat16), v.astype(jnp.bfloat16),
                       preferred_element_type=jnp.float32))           # (TB, N, dv)

    # Assemble full width once: single residual add + single full-width store
    # (no per-head 16-lane masked stores, no per-head sliced residual adds).
    result = jnp.concatenate(head_outs, axis=-1) + f_a     # (TB, N, df)
    out_ref[...] = result.astype(out_ref.dtype)


def _pick_block_b(B, N, df):
    """Largest divisor of B whose VMEM tile footprint stays well inside the
    smallest default scoped-VMEM budget across TPU generations.

    Per-batch-element footprint (f32): in + out blocks double-buffered by
    BlockSpec (2 * 2 * N*df*4 bytes) plus a generous 256 KiB for in-kernel
    intermediates (proj, per-head scores/softmax temps).  Budget ~8 MiB
    (half of v5e's 16 MiB scoped default; far under v7x's 64 MiB physical),
    leaving room for the ~36 KiB resident weights and compiler scratch.

    At the demo sizes (B=2, N=16, df=64) this returns B -> grid=(1,): the
    kernel is overhead-bound, so we avoid the ~0.35 us fixed cost per extra
    grid step and do not shard megacore over sub-microsecond work.  Large B
    naturally splits into multiple "parallel" programs with multi-us work.
    """
    per_elem = 4 * N * df * 4 + 256 * 1024
    budget = 8 * 1024 * 1024
    cap = max(1, budget // per_elem)
    best = 1
    for d in range(1, B + 1):
        if B % d == 0 and d <= cap:
            best = d
    return best


def relation_module(f_a, w_fused, wfix, *, key_feature_dim, block_b=None):
    """f_a: (B, N, df) f32; w_fused: from make_fused_weight(); wfix: (Nr, N, N)."""
    B, N, df = f_a.shape
    Nr = wfix.shape[0]
    dk = key_feature_dim
    dv = df // Nr
    P = w_fused.shape[1]
    assert P == Nr * (2 * dk + dv), "fused weight does not match head dims"

    if block_b is None:
        block_b = _pick_block_b(B, N, df)
    assert B % block_b == 0, "block_b must divide B"
    grid = (B // block_b,)

    kernel = functools.partial(relation_module_kernel,
                               n_relations=Nr, dk=dk, dv=dv)

    return pl.pallas_call(
        kernel,
        out_shape=jax.ShapeDtypeStruct((B, N, df), f_a.dtype),
        grid=grid,
        in_specs=[
            pl.BlockSpec((block_b, N, df), lambda b: (b, 0, 0)),
            # Resident weights via constant index_maps (~36 KiB total); small
            # enough that single-buffering them (pipeline_mode=pl.Buffered(1))
            # is unnecessary headroom at current block_b caps.
            pl.BlockSpec((df, P), lambda b: (0, 0)),
            pl.BlockSpec((Nr, N, N), lambda b: (0, 0, 0)),
        ],
        out_specs=pl.BlockSpec((block_b, N, df), lambda b: (b, 0, 0)),
        compiler_params=pltpu.CompilerParams(
            dimension_semantics=("parallel",),
            vmem_limit_bytes=32 * 1024 * 1024,
        ),
    )(f_a, w_fused, wfix)


def reference_jax(f_a, wk, wq, wv, wfix):
    """Pure-JAX f32 reference mirroring the PyTorch forward exactly."""
    B, N, df = f_a.shape
    Nr, _, dk = wk.shape
    eye = jnp.eye(N, dtype=bool)
    outs = []
    for r in range(Nr):
        k = f_a @ wk[r]                      # (B, N, dk)
        q = f_a @ wq[r]                      # (B, N, dk)
        v = f_a @ wv[r]                      # (B, N, dv)
        s = jnp.einsum("bmd,bnd->bmn", k, q) / np.sqrt(dk)
        s = jnp.where(eye[None], 0.0, s)
        w = jax.nn.softmax(s, axis=-1)
        w = w + wfix[r][None]
        w = jnp.where(eye[None], 0.0, w)
        outs.append(jnp.einsum("bmn,bnd->bmd", w, v))
    return jnp.concatenate(outs, axis=-1) + f_a


if __name__ == "__main__":
    # module hyper-params (small, consistent with the PyTorch defaults' structure)
    n_relations = 4
    appearance_feature_dim = 64   # df
    key_feature_dim = 8           # dk
    num_parts = 16                # N (forward requires f_a's N == num_parts for w_fix)
    value_feature_dim = appearance_feature_dim // n_relations  # dv = 16
    batch = 2

    key = jax.random.PRNGKey(0)
    k_in, k_wk, k_wq, k_wv, k_wf = jax.random.split(key, 5)

    f_a = jax.random.normal(k_in, (batch, num_parts, appearance_feature_dim), jnp.float32)

    # Linear weights stored [in, out] (nn.Linear default init range)
    lim = 1.0 / np.sqrt(appearance_feature_dim)
    wk = jax.random.uniform(k_wk, (n_relations, appearance_feature_dim, key_feature_dim),
                            jnp.float32, -lim, lim)
    wq = jax.random.uniform(k_wq, (n_relations, appearance_feature_dim, key_feature_dim),
                            jnp.float32, -lim, lim)
    wv = jax.random.uniform(k_wv, (n_relations, appearance_feature_dim, value_feature_dim),
                            jnp.float32, -lim, lim)
    limN = 1.0 / np.sqrt(num_parts)
    wfix = jax.random.uniform(k_wf, (n_relations, num_parts, num_parts),
                              jnp.float32, -limN, limN)

    # Fused weight is built ONCE here (parameter-init time), not per forward call.
    w_fused = jax.block_until_ready(make_fused_weight(wk, wq, wv))

    out = jax.block_until_ready(
        relation_module(f_a, w_fused, wfix, key_feature_dim=key_feature_dim))

    ref = jax.block_until_ready(reference_jax(f_a, wk, wq, wv, wfix))
    # Tolerance accounts for bf16 MXU operands (f32 accumulation) and the EUP
    # approximate reciprocal in the softmax; the reference is pure f32.
    np.testing.assert_allclose(np.asarray(out), np.asarray(ref), rtol=1e-2, atol=1e-2)

    print("KERNEL_OK")
</pallas_src>

<mosaic_0001>
module attributes {stable_mosaic.version = 11 : i64} {
  func.func @relation_module_kernel(%arg0: i32, %arg1: memref<2x16x64xf32, #tpu.memory_space<vmem>>, %arg2: memref<64x128xbf16, #tpu.memory_space<vmem>>, %arg3: memref<4x16x16xf32, #tpu.memory_space<vmem>>, %arg4: memref<2x16x64xf32, #tpu.memory_space<vmem>>) attributes {dimension_semantics = [#tpu.dimension_semantics<parallel>], iteration_bounds = array<i64: 1>, scalar_prefetch = 0 : i64, scratch_operands = 0 : i64, tpu.core_type = #tpu.core_type<tc>, window_params = [{transform_indices = @transform_0, window_bounds = array<i64: 2, 16, 64>}, {pipeline_mode = #tpu.pipeline_mode<synchronous>, transform_indices = @transform_1, window_bounds = array<i64: 64, 128>}, {pipeline_mode = #tpu.pipeline_mode<synchronous>, transform_indices = @transform_2, window_bounds = array<i64: 4, 16, 16>}, {transform_indices = @transform_3, window_bounds = array<i64: 2, 16, 64>}]} {
    %c0 = arith.constant 0 : index
    %c0_0 = arith.constant 0 : index
    %c0_1 = arith.constant 0 : index
    %0 = vector.load %arg1[%c0, %c0_0, %c0_1] : memref<2x16x64xf32, #tpu.memory_space<vmem>>, vector<2x16x64xf32>
    %1 = vector.shape_cast %0 : vector<2x16x64xf32> to vector<32x64xf32>
    %2 = arith.truncf %1 : vector<32x64xf32> to vector<32x64xbf16>
    %c0_2 = arith.constant 0 : index
    %c0_3 = arith.constant 0 : index
    %3 = vector.load %arg2[%c0_2, %c0_3] : memref<64x128xbf16, #tpu.memory_space<vmem>>, vector<64x128xbf16>
    %cst = arith.constant dense<0.000000e+00> : vector<32x128xf32>
    %4 = tpu.matmul %2, %3, %cst {dimension_numbers = #tpu.dot_dimension_numbers<[1], [0], [0], [1], [0, 0, 1, 1], [], []>} : vector<32x64xbf16>, vector<64x128xbf16>, vector<32x128xf32> -> vector<32x128xf32>
    %5 = vector.shape_cast %4 : vector<32x128xf32> to vector<2x16x128xf32>
    %6 = tpu.iota {dimensions = array<i32: 0>} : vector<16x16xi32>
    %7 = tpu.iota {dimensions = array<i32: 1>} : vector<16x16xi32>
    %8 = arith.cmpi eq, %6, %7 : vector<16x16xi32>
    %9 = vector.shape_cast %8 : vector<16x16xi1> to vector<1x16x16xi1>
    %c0_4 = arith.constant 0 : index
    %c0_5 = arith.constant 0 : index
    %c0_6 = arith.constant 0 : index
    %10 = vector.load %arg3[%c0_4, %c0_5, %c0_6] : memref<4x16x16xf32, #tpu.memory_space<vmem>>, vector<4x16x16xf32>
    %11 = vector.extract_strided_slice %5 {offsets = [0, 0, 0], sizes = [2, 16, 32], strides = [1, 1, 1]} : vector<2x16x128xf32> to vector<2x16x32xf32>
    %12 = vector.extract_strided_slice %11 {offsets = [0, 0, 0], sizes = [2, 16, 8], strides = [1, 1, 1]} : vector<2x16x32xf32> to vector<2x16x8xf32>
    %13 = vector.extract_strided_slice %11 {offsets = [0, 0, 8], sizes = [2, 16, 8], strides = [1, 1, 1]} : vector<2x16x32xf32> to vector<2x16x8xf32>
    %14 = vector.extract_strided_slice %11 {offsets = [0, 0, 16], sizes = [2, 16, 16], strides = [1, 1, 1]} : vector<2x16x32xf32> to vector<2x16x16xf32>
    %15 = arith.truncf %12 : vector<2x16x8xf32> to vector<2x16x8xbf16>
    %16 = arith.truncf %13 : vector<2x16x8xf32> to vector<2x16x8xbf16>
    "tpu.trace_start"() <{level = 10 : i32, message = "bmd,bnd->bmn"}> : () -> ()
    %cst_7 = arith.constant dense<0.000000e+00> : vector<2x16x16xf32>
    %17 = tpu.matmul %15, %16, %cst_7 {dimension_numbers = #tpu.dot_dimension_numbers<[2], [2], [1], [1], [0, 0, 0, 1, 1, 1], [0], [0]>} : vector<2x16x8xbf16>, vector<2x16x8xbf16>, vector<2x16x16xf32> -> vector<2x16x16xf32>
    "tpu.trace_stop"() : () -> ()
    %cst_8 = arith.constant 0.353553385 : f32
    %18 = vector.broadcast %cst_8 : f32 to vector<2x16x16xf32>
    %19 = arith.mulf %17, %18 : vector<2x16x16xf32>
    %cst_9 = arith.constant 0.000000e+00 : f32
    %20 = vector.shape_cast %9 : vector<1x16x16xi1> to vector<1x16x16xi1>
    %21 = vector.broadcast %20 : vector<1x16x16xi1> to vector<2x16x16xi1>
    %22 = vector.broadcast %cst_9 : f32 to vector<2x16x16xf32>
    %23 = arith.select %21, %22, %19 : vector<2x16x16xi1>, vector<2x16x16xf32>
    %cst_10 = arith.constant dense<0xFF800000> : vector<2x16xf32>
    %24 = vector.multi_reduction <maximumf>, %23, %cst_10 [2] : vector<2x16x16xf32> to vector<2x16xf32>
    %25 = vector.shape_cast %24 : vector<2x16xf32> to vector<2x16x1xf32>
    %26 = vector.broadcast %25 : vector<2x16x1xf32> to vector<2x16x16xf32>
    %27 = arith.subf %23, %26 : vector<2x16x16xf32>
    %28 = math.exp %27 : vector<2x16x16xf32>
    %cst_11 = arith.constant dense<0.000000e+00> : vector<2x16xf32>
    %29 = vector.multi_reduction <add>, %28, %cst_11 [2] : vector<2x16x16xf32> to vector<2x16xf32>
    %30 = vector.shape_cast %29 : vector<2x16xf32> to vector<2x16x1xf32>
    %31 = tpu.reciprocal %30 {approx = true} : vector<2x16x1xf32> -> vector<2x16x1xf32>
    %32 = vector.broadcast %31 : vector<2x16x1xf32> to vector<2x16x16xf32>
    %33 = arith.mulf %28, %32 : vector<2x16x16xf32>
    %34 = vector.extract_strided_slice %10 {offsets = [0, 0, 0], sizes = [1, 16, 16], strides = [1, 1, 1]} : vector<4x16x16xf32> to vector<1x16x16xf32>
    %35 = vector.shape_cast %34 : vector<1x16x16xf32> to vector<16x16xf32>
    %36 = vector.shape_cast %35 : vector<16x16xf32> to vector<1x16x16xf32>
    %37 = vector.broadcast %36 : vector<1x16x16xf32> to vector<2x16x16xf32>
    %38 = arith.addf %33, %37 : vector<2x16x16xf32>
    %cst_12 = arith.constant 0.000000e+00 : f32
    %39 = vector.shape_cast %9 : vector<1x16x16xi1> to vector<1x16x16xi1>
    %40 = vector.broadcast %39 : vector<1x16x16xi1> to vector<2x16x16xi1>
    %41 = vector.broadcast %cst_12 : f32 to vector<2x16x16xf32>
    %42 = arith.select %40, %41, %38 : vector<2x16x16xi1>, vector<2x16x16xf32>
    %43 = arith.truncf %42 : vector<2x16x16xf32> to vector<2x16x16xbf16>
    %44 = arith.truncf %14 : vector<2x16x16xf32> to vector<2x16x16xbf16>
    "tpu.trace_start"() <{level = 10 : i32, message = "bmn,bnd->bmd"}> : () -> ()
    %cst_13 = arith.constant dense<0.000000e+00> : vector<2x16x16xf32>
    %45 = tpu.matmul %43, %44, %cst_13 {dimension_numbers = #tpu.dot_dimension_numbers<[2], [1], [1], [2], [0, 0, 0, 1, 1, 2], [0], [0]>} : vector<2x16x16xbf16>, vector<2x16x16xbf16>, vector<2x16x16xf32> -> vector<2x16x16xf32>
    "tpu.trace_stop"() : () -> ()
    %46 = vector.extract_strided_slice %5 {offsets = [0, 0, 32], sizes = [2, 16, 32], strides = [1, 1, 1]} : vector<2x16x128xf32> to vector<2x16x32xf32>
    %47 = vector.extract_strided_slice %46 {offsets = [0, 0, 0], sizes = [2, 16, 8], strides = [1, 1, 1]} : vector<2x16x32xf32> to vector<2x16x8xf32>
    %48 = vector.extract_strided_slice %46 {offsets = [0, 0, 8], sizes = [2, 16, 8], strides = [1, 1, 1]} : vector<2x16x32xf32> to vector<2x16x8xf32>
    %49 = vector.extract_strided_slice %46 {offsets = [0, 0, 16], sizes = [2, 16, 16], strides = [1, 1, 1]} : vector<2x16x32xf32> to vector<2x16x16xf32>
    %50 = arith.truncf %47 : vector<2x16x8xf32> to vector<2x16x8xbf16>
    %51 = arith.truncf %48 : vector<2x16x8xf32> to vector<2x16x8xbf16>
    "tpu.trace_start"() <{level = 10 : i32, message = "bmd,bnd->bmn"}> : () -> ()
    %cst_14 = arith.constant dense<0.000000e+00> : vector<2x16x16xf32>
    %52 = tpu.matmul %50, %51, %cst_14 {dimension_numbers = #tpu.dot_dimension_numbers<[2], [2], [1], [1], [0, 0, 0, 1, 1, 1], [0], [0]>} : vector<2x16x8xbf16>, vector<2x16x8xbf16>, vector<2x16x16xf32> -> vector<2x16x16xf32>
    "tpu.trace_stop"() : () -> ()
    %cst_15 = arith.constant 0.353553385 : f32
    %53 = vector.broadcast %cst_15 : f32 to vector<2x16x16xf32>
    %54 = arith.mulf %52, %53 : vector<2x16x16xf32>
    %cst_16 = arith.constant 0.000000e+00 : f32
    %55 = vector.shape_cast %9 : vector<1x16x16xi1> to vector<1x16x16xi1>
    %56 = vector.broadcast %55 : vector<1x16x16xi1> to vector<2x16x16xi1>
    %57 = vector.broadcast %cst_16 : f32 to vector<2x16x16xf32>
    %58 = arith.select %56, %57, %54 : vector<2x16x16xi1>, vector<2x16x16xf32>
    %cst_17 = arith.constant dense<0xFF800000> : vector<2x16xf32>
    %59 = vector.multi_reduction <maximumf>, %58, %cst_17 [2] : vector<2x16x16xf32> to vector<2x16xf32>
    %60 = vector.shape_cast %59 : vector<2x16xf32> to vector<2x16x1xf32>
    %61 = vector.broadcast %60 : vector<2x16x1xf32> to vector<2x16x16xf32>
    %62 = arith.subf %58, %61 : vector<2x16x16xf32>
    %63 = math.exp %62 : vector<2x16x16xf32>
    %cst_18 = arith.constant dense<0.000000e+00> : vector<2x16xf32>
    %64 = vector.multi_reduction <add>, %63, %cst_18 [2] : vector<2x16x16xf32> to vector<2x16xf32>
    %65 = vector.shape_cast %64 : vector<2x16xf32> to vector<2x16x1xf32>
    %66 = tpu.reciprocal %65 {approx = true} : vector<2x16x1xf32> -> vector<2x16x1xf32>
    %67 = vector.broadcast %66 : vector<2x16x1xf32> to vector<2x16x16xf32>
    %68 = arith.mulf %63, %67 : vector<2x16x16xf32>
    %69 = vector.extract_strided_slice %10 {offsets = [1, 0, 0], sizes = [1, 16, 16], strides = [1, 1, 1]} : vector<4x16x16xf32> to vector<1x16x16xf32>
    %70 = vector.shape_cast %69 : vector<1x16x16xf32> to vector<16x16xf32>
    %71 = vector.shape_cast %70 : vector<16x16xf32> to vector<1x16x16xf32>
    %72 = vector.broadcast %71 : vector<1x16x16xf32> to vector<2x16x16xf32>
    %73 = arith.addf %68, %72 : vector<2x16x16xf32>
    %cst_19 = arith.constant 0.000000e+00 : f32
    %74 = vector.shape_cast %9 : vector<1x16x16xi1> to vector<1x16x16xi1>
    %75 = vector.broadcast %74 : vector<1x16x16xi1> to vector<2x16x16xi1>
    %76 = vector.broadcast %cst_19 : f32 to vector<2x16x16xf32>
    %77 = arith.select %75, %76, %73 : vector<2x16x16xi1>, vector<2x16x16xf32>
    %78 = arith.truncf %77 : vector<2x16x16xf32> to vector<2x16x16xbf16>
    %79 = arith.truncf %49 : vector<2x16x16xf32> to vector<2x16x16xbf16>
    "tpu.trace_start"() <{level = 10 : i32, message = "bmn,bnd->bmd"}> : () -> ()
    %cst_20 = arith.constant dense<0.000000e+00> : vector<2x16x16xf32>
    %80 = tpu.matmul %78, %79, %cst_20 {dimension_numbers = #tpu.dot_dimension_numbers<[2], [1], [1], [2], [0, 0, 0, 1, 1, 2], [0], [0]>} : vector<2x16x16xbf16>, vector<2x16x16xbf16>, vector<2x16x16xf32> -> vector<2x16x16xf32>
    "tpu.trace_stop"() : () -> ()
    %81 = vector.extract_strided_slice %5 {offsets = [0, 0, 64], sizes = [2, 16, 32], strides = [1, 1, 1]} : vector<2x16x128xf32> to vector<2x16x32xf32>
    %82 = vector.extract_strided_slice %81 {offsets = [0, 0, 0], sizes = [2, 16, 8], strides = [1, 1, 1]} : vector<2x16x32xf32> to vector<2x16x8xf32>
    %83 = vector.extract_strided_slice %81 {offsets = [0, 0, 8], sizes = [2, 16, 8], strides = [1, 1, 1]} : vector<2x16x32xf32> to vector<2x16x8xf32>
    %84 = vector.extract_strided_slice %81 {offsets = [0, 0, 16], sizes = [2, 16, 16], strides = [1, 1, 1]} : vector<2x16x32xf32> to vector<2x16x16xf32>
    %85 = arith.truncf %82 : vector<2x16x8xf32> to vector<2x16x8xbf16>
    %86 = arith.truncf %83 : vector<2x16x8xf32> to vector<2x16x8xbf16>
    "tpu.trace_start"() <{level = 10 : i32, message = "bmd,bnd->bmn"}> : () -> ()
    %cst_21 = arith.constant dense<0.000000e+00> : vector<2x16x16xf32>
    %87 = tpu.matmul %85, %86, %cst_21 {dimension_numbers = #tpu.dot_dimension_numbers<[2], [2], [1], [1], [0, 0, 0, 1, 1, 1], [0], [0]>} : vector<2x16x8xbf16>, vector<2x16x8xbf16>, vector<2x16x16xf32> -> vector<2x16x16xf32>
    "tpu.trace_stop"() : () -> ()
    %cst_22 = arith.constant 0.353553385 : f32
    %88 = vector.broadcast %cst_22 : f32 to vector<2x16x16xf32>
    %89 = arith.mulf %87, %88 : vector<2x16x16xf32>
    %cst_23 = arith.constant 0.000000e+00 : f32
    %90 = vector.shape_cast %9 : vector<1x16x16xi1> to vector<1x16x16xi1>
    %91 = vector.broadcast %90 : vector<1x16x16xi1> to vector<2x16x16xi1>
    %92 = vector.broadcast %cst_23 : f32 to vector<2x16x16xf32>
    %93 = arith.select %91, %92, %89 : vector<2x16x16xi1>, vector<2x16x16xf32>
    %cst_24 = arith.constant dense<0xFF800000> : vector<2x16xf32>
    %94 = vector.multi_reduction <maximumf>, %93, %cst_24 [2] : vector<2x16x16xf32> to vector<2x16xf32>
    %95 = vector.shape_cast %94 : vector<2x16xf32> to vector<2x16x1xf32>
    %96 = vector.broadcast %95 : vector<2x16x1xf32> to vector<2x16x16xf32>
    %97 = arith.subf %93, %96 : vector<2x16x16xf32>
    %98 = math.exp %97 : vector<2x16x16xf32>
    %cst_25 = arith.constant dense<0.000000e+00> : vector<2x16xf32>
    %99 = vector.multi_reduction <add>, %98, %cst_25 [2] : vector<2x16x16xf32> to vector<2x16xf32>
    %100 = vector.shape_cast %99 : vector<2x16xf32> to vector<2x16x1xf32>
    %101 = tpu.reciprocal %100 {approx = true} : vector<2x16x1xf32> -> vector<2x16x1xf32>
    %102 = vector.broadcast %101 : vector<2x16x1xf32> to vector<2x16x16xf32>
    %103 = arith.mulf %98, %102 : vector<2x16x16xf32>
    %104 = vector.extract_strided_slice %10 {offsets = [2, 0, 0], sizes = [1, 16, 16], strides = [1, 1, 1]} : vector<4x16x16xf32> to vector<1x16x16xf32>
    %105 = vector.shape_cast %104 : vector<1x16x16xf32> to vector<16x16xf32>
    %106 = vector.shape_cast %105 : vector<16x16xf32> to vector<1x16x16xf32>
    %107 = vector.broadcast %106 : vector<1x16x16xf32> to vector<2x16x16xf32>
    %108 = arith.addf %103, %107 : vector<2x16x16xf32>
    %cst_26 = arith.constant 0.000000e+00 : f32
    %109 = vector.shape_cast %9 : vector<1x16x16xi1> to vector<1x16x16xi1>
    %110 = vector.broadcast %109 : vector<1x16x16xi1> to vector<2x16x16xi1>
    %111 = vector.broadcast %cst_26 : f32 to vector<2x16x16xf32>
    %112 = arith.select %110, %111, %108 : vector<2x16x16xi1>, vector<2x16x16xf32>
    %113 = arith.truncf %112 : vector<2x16x16xf32> to vector<2x16x16xbf16>
    %114 = arith.truncf %84 : vector<2x16x16xf32> to vector<2x16x16xbf16>
    "tpu.trace_start"() <{level = 10 : i32, message = "bmn,bnd->bmd"}> : () -> ()
    %cst_27 = arith.constant dense<0.000000e+00> : vector<2x16x16xf32>
    %115 = tpu.matmul %113, %114, %cst_27 {dimension_numbers = #tpu.dot_dimension_numbers<[2], [1], [1], [2], [0, 0, 0, 1, 1, 2], [0], [0]>} : vector<2x16x16xbf16>, vector<2x16x16xbf16>, vector<2x16x16xf32> -> vector<2x16x16xf32>
    "tpu.trace_stop"() : () -> ()
    %116 = vector.extract_strided_slice %5 {offsets = [0, 0, 96], sizes = [2, 16, 32], strides = [1, 1, 1]} : vector<2x16x128xf32> to vector<2x16x32xf32>
    %117 = vector.extract_strided_slice %116 {offsets = [0, 0, 0], sizes = [2, 16, 8], strides = [1, 1, 1]} : vector<2x16x32xf32> to vector<2x16x8xf32>
    %118 = vector.extract_strided_slice %116 {offsets = [0, 0, 8], sizes = [2, 16, 8], strides = [1, 1, 1]} : vector<2x16x32xf32> to vector<2x16x8xf32>
    %119 = vector.extract_strided_slice %116 {offsets = [0, 0, 16], sizes = [2, 16, 16], strides = [1, 1, 1]} : vector<2x16x32xf32> to vector<2x16x16xf32>
    %120 = arith.truncf %117 : vector<2x16x8xf32> to vector<2x16x8xbf16>
    %121 = arith.truncf %118 : vector<2x16x8xf32> to vector<2x16x8xbf16>
    "tpu.trace_start"() <{level = 10 : i32, message = "bmd,bnd->bmn"}> : () -> ()
    %cst_28 = arith.constant dense<0.000000e+00> : vector<2x16x16xf32>
    %122 = tpu.matmul %120, %121, %cst_28 {dimension_numbers = #tpu.dot_dimension_numbers<[2], [2], [1], [1], [0, 0, 0, 1, 1, 1], [0], [0]>} : vector<2x16x8xbf16>, vector<2x16x8xbf16>, vector<2x16x16xf32> -> vector<2x16x16xf32>
    "tpu.trace_stop"() : () -> ()
    %cst_29 = arith.constant 0.353553385 : f32
    %123 = vector.broadcast %cst_29 : f32 to vector<2x16x16xf32>
    %124 = arith.mulf %122, %123 : vector<2x16x16xf32>
    %cst_30 = arith.constant 0.000000e+00 : f32
    %125 = vector.shape_cast %9 : vector<1x16x16xi1> to vector<1x16x16xi1>
    %126 = vector.broadcast %125 : vector<1x16x16xi1> to vector<2x16x16xi1>
    %127 = vector.broadcast %cst_30 : f32 to vector<2x16x16xf32>
    %128 = arith.select %126, %127, %124 : vector<2x16x16xi1>, vector<2x16x16xf32>
    %cst_31 = arith.constant dense<0xFF800000> : vector<2x16xf32>
    %129 = vector.multi_reduction <maximumf>, %128, %cst_31 [2] : vector<2x16x16xf32> to vector<2x16xf32>
    %130 = vector.shape_cast %129 : vector<2x16xf32> to vector<2x16x1xf32>
    %131 = vector.broadcast %130 : vector<2x16x1xf32> to vector<2x16x16xf32>
    %132 = arith.subf %128, %131 : vector<2x16x16xf32>
    %133 = math.exp %132 : vector<2x16x16xf32>
    %cst_32 = arith.constant dense<0.000000e+00> : vector<2x16xf32>
    %134 = vector.multi_reduction <add>, %133, %cst_32 [2] : vector<2x16x16xf32> to vector<2x16xf32>
    %135 = vector.shape_cast %134 : vector<2x16xf32> to vector<2x16x1xf32>
    %136 = tpu.reciprocal %135 {approx = true} : vector<2x16x1xf32> -> vector<2x16x1xf32>
    %137 = vector.broadcast %136 : vector<2x16x1xf32> to vector<2x16x16xf32>
    %138 = arith.mulf %133, %137 : vector<2x16x16xf32>
    %139 = vector.extract_strided_slice %10 {offsets = [3, 0, 0], sizes = [1, 16, 16], strides = [1, 1, 1]} : vector<4x16x16xf32> to vector<1x16x16xf32>
    %140 = vector.shape_cast %139 : vector<1x16x16xf32> to vector<16x16xf32>
    %141 = vector.shape_cast %140 : vector<16x16xf32> to vector<1x16x16xf32>
    %142 = vector.broadcast %141 : vector<1x16x16xf32> to vector<2x16x16xf32>
    %143 = arith.addf %138, %142 : vector<2x16x16xf32>
    %cst_33 = arith.constant 0.000000e+00 : f32
    %144 = vector.shape_cast %9 : vector<1x16x16xi1> to vector<1x16x16xi1>
    %145 = vector.broadcast %144 : vector<1x16x16xi1> to vector<2x16x16xi1>
    %146 = vector.broadcast %cst_33 : f32 to vector<2x16x16xf32>
    %147 = arith.select %145, %146, %143 : vector<2x16x16xi1>, vector<2x16x16xf32>
    %148 = arith.truncf %147 : vector<2x16x16xf32> to vector<2x16x16xbf16>
    %149 = arith.truncf %119 : vector<2x16x16xf32> to vector<2x16x16xbf16>
    "tpu.trace_start"() <{level = 10 : i32, message = "bmn,bnd->bmd"}> : () -> ()
    %cst_34 = arith.constant dense<0.000000e+00> : vector<2x16x16xf32>
    %150 = tpu.matmul %148, %149, %cst_34 {dimension_numbers = #tpu.dot_dimension_numbers<[2], [1], [1], [2], [0, 0, 0, 1, 1, 2], [0], [0]>} : vector<2x16x16xbf16>, vector<2x16x16xbf16>, vector<2x16x16xf32> -> vector<2x16x16xf32>
    "tpu.trace_stop"() : () -> ()
    %151 = tpu.concatenate %45, %80, %115, %150 in 2 : vector<2x16x16xf32>, vector<2x16x16xf32>, vector<2x16x16xf32>, vector<2x16x16xf32> -> vector<2x16x64xf32>
    %152 = arith.addf %151, %0 : vector<2x16x64xf32>
    %c0_35 = arith.constant 0 : index
    %c0_36 = arith.constant 0 : index
    %c0_37 = arith.constant 0 : index
    %153 = vector.load %arg4[%c0_35, %c0_36, %c0_37] : memref<2x16x64xf32, #tpu.memory_space<vmem>>, vector<2x16x64xf32>
    tpu.vector_store %arg4[%c0_35, %c0_36, %c0_37], %152 {strides = array<i32>} : memref<2x16x64xf32, #tpu.memory_space<vmem>>, vector<2x16x64xf32>,
    return
  }
  func.func @transform_0(%arg0: i32) -> (i32, i32, i32) {
    %c0_i32 = arith.constant 0 : i32
    %c0_i32_0 = arith.constant 0 : i32
    %c0_i32_1 = arith.constant 0 : i32
    return %arg0, %c0_i32, %c0_i32_0 : i32, i32, i32
  }
  func.func @transform_1(%arg0: i32) -> (i32, i32) {
    %c0_i32 = arith.constant 0 : i32
    %c0_i32_0 = arith.constant 0 : i32
    %c0_i32_1 = arith.constant 0 : i32
    return %c0_i32, %c0_i32_0 : i32, i32
  }
  func.func @transform_2(%arg0: i32) -> (i32, i32, i32) {
    %c0_i32 = arith.constant 0 : i32
    %c0_i32_0 = arith.constant 0 : i32
    %c0_i32_1 = arith.constant 0 : i32
    %c0_i32_2 = arith.constant 0 : i32
    return %c0_i32, %c0_i32_0, %c0_i32_1 : i32, i32, i32
  }
  func.func @transform_3(%arg0: i32) -> (i32, i32, i32) {
    %c0_i32 = arith.constant 0 : i32
    %c0_i32_0 = arith.constant 0 : i32
    %c0_i32_1 = arith.constant 0 : i32
    return %arg0, %c0_i32, %c0_i32_0 : i32, i32, i32
  }
}

</mosaic_0001>

<bundles_post_ra>
// kernel: tpu_custom_call.1
= control target key start
LH: loop header
LB: loop body
LE: loop exit
PB: predicated region body
PF: predicated region fallthrough
CT: control target
= control target key end

     0   :  { %8 = vsyncpa [#allocation3], 0  ;;  %s1974_s0 = inlined_call_operand.hbm [shape: f32[2,16,64], index: 0, kind: input, shape index: {}]   ;;  %s1975_s1 = inlined_call_operand.hbm [shape: bf16[64,128], index: 1, kind: input, shape index: {}]   ;;  %s1976_s2 = inlined_call_operand.hbm [shape: f32[4,16,16], index: 2, kind: input, shape index: {}]   ;;  %s1977_s3 = inlined_call_operand.hbm [shape: f32[2,16,64], index: 3, kind: output, shape index: {}]  }
   0x1   :  { %9 = vsyncpa [#allocation6], 0 }
   0x2   :  { %10 = vsyncpa [#allocation4], 0  ;;  %s1638_s12 = smov [#allocation5]  }
   0x3   :  { %s28_s13 = sshll.u32 %s1638_s12, 4  ;;  %s29_s13 = int_to_ptr.vmem [resolvable:$true] %s28_s13 }
   0x4   :  { %s1560_s14 = scalar_lea.vmem %s29_s13, 512  ;;  %p1565_p1 = scmp.lt.s32.totalorder %s29_s13, %s29_s13 }
   0x5   :  { %p1561_p0 = scmp.ne.s32.totalorder %s29_s13, %s1560_s14  ;;  %p1566_p2 = scmp.lt.s32.totalorder %s1560_s14, %s1560_s14 }
   0x7   :  { %p1567_p3 = por %p1566_p2, %p1565_p1 }
   0x9   :  { %p1568_p4 = pnand %p1567_p3, %p1561_p0 }
   0xb   :  { %1571 = shalt.err (!%p1568_p4)
}
   0xc   :  { %s1639_s15 = smov 64   ;;  %s1640_s16 = smov 4  }
   0xd   :  { %34 = dma.hbm_to_vmem [thread:$0]  %s1975_s1, 512, %s29_s13, [#allocation6], %s1639_s15, %s1639_s15, %s1640_s16  }
   0xe   :  { %s1641_s19 = smov [#allocation2]  }
   0xf   :  { %s16_s20 = sshll.u32 %s1641_s19, 4  ;;  %s17_s20 = int_to_ptr.vmem [resolvable:$true] %s16_s20 }
  0x10   :  { %s1580_s21 = scalar_lea.vmem %s17_s20, 512  ;;  %p1585_p6 = scmp.lt.s32.totalorder %s17_s20, %s17_s20 }
  0x11   :  { %p1581_p5 = scmp.ne.s32.totalorder %s17_s20, %s1580_s21  ;;  %p1586_p7 = scmp.lt.s32.totalorder %s1580_s21, %s1580_s21 }
  0x13   :  { %p1587_p8 = por %p1586_p7, %p1585_p6 }
  0x15   :  { %p1588_p9 = pnand %p1587_p8, %p1581_p5 }
  0x17   :  { %1591 = shalt.err (!%p1588_p9)
}
  0x18   :  { %s1642_s22 = smov 128   ;;  %s1643_s23 = smov 8  }
  0x19   :  { %22 = dma.hbm_to_vmem [thread:$0]  %s1974_s0, 512, %s17_s20, [#allocation3], %s1642_s22, %s1642_s22, %s1643_s23  }
  0x1a   :  { %s1644_s1 = smov [#allocation7]  }
  0x1b   :  { %s40_s26 = sshll.u32 %s1644_s1, 4  ;;  %s41_s26 = int_to_ptr.vmem [resolvable:$true] %s40_s26 }
  0x1c   :  { %s1600_s27 = scalar_lea.vmem %s41_s26, 1024  ;;  %p1605_p11 = scmp.lt.s32.totalorder %s41_s26, %s41_s26 }
  0x1d   :  { %p1601_p10 = scmp.ne.s32.totalorder %s41_s26, %s1600_s27  ;;  %p1606_p12 = scmp.lt.s32.totalorder %s1600_s27, %s1600_s27 }
  0x1f   :  { %p1607_p13 = por %p1606_p12, %p1605_p11 }
  0x21   :  { %p1608_p0 = pnand %p1607_p13, %p1601_p10 }
  0x23   :  { %1611 = shalt.err (!%p1608_p0)
}
  0x24   :  { %46 = dma.hbm_to_vmem [thread:$0]  %s1976_s2, 1024, %s41_s26, [#allocation6], %s1642_s22, %s1642_s22, %s1643_s23  }
  0x25   :  { %1632 = dma.done.wait [#allocation3], 512  }
  0x26   :  { %1633 = vsyncadd [#allocation3], 4294966784 }
  0x27   :  { %1634 = dma.done.wait [#allocation6], 1536  }
  0x28   :  { %1635 = vsyncadd [#allocation6], 4294965760  ;;  %v1480_v0 = vld [vmem:[#allocation5 + $0x18] sm:$0xff]   ;;  %v1481_v1 = vld [vmem:[#allocation5 + $0x10] sm:$0xff]   ;;  %vm95_vm0 = vcmask 523264   ;;  %v1645_v10 = vmov 0.0   ;;  %v151_v21 = vlaneseq }
  0x29   :  { %1352 = vmatprep.subr.bf16.mxu0 %v1480_v0  ;;  %v1482_v2 = vld [vmem:[#allocation5 + $0x8] sm:$0xff]   ;;  %v57_v3 = vld [vmem:[#allocation2] sm:$0xff]  ;;  %v59_v7 = vld [vmem:[#allocation2 + $0x10] sm:$0xff]  ;;  %1364 = vmatprep.subr.bf16.mxu1 %v1645_v10  ;;  %vm1646_vm1 = vmmov 0   ;;  %s1647_s0 = smov 120   ;;  %vm171_vm2 = vcmask 64512  }
  0x2a   :  { %1353 = vmatpush3.bf16.msra.mxu0 %v1480_v0  ;;  %v58_v4 = vld [vmem:[#allocation2 + $0x8] sm:$0xff]  ;;  %v1483_v6 = vld [vmem:[#allocation5] sm:$0xff]   ;;  %v60_v8 = vld [vmem:[#allocation2 + $0x18] sm:$0xff]  ;;  %1366 = vmatprep.mubr.msk.bf16.mxu1 %vm1646_vm1, %v1645_v10  ;;  %v152_v22 = vshrl.u32 %v151_v21, 7  ;;  %v155_v23 = vand.u32 127, %v151_v21  ;;  %vm281_vm4 = vcmask 130048  }
  0x2b   :  { %1354 = vmatprep.subr.bf16.mxu0 %v1481_v1  ;;  %v61_v5 = vpack.c.bf16 %v58_v4, %v57_v3  ;;  %v62_v9 = vpack.c.bf16 %v60_v8, %v59_v7  ;;  %s1648_s2 = smov 112   ;;  %s1649_s30 = smov 88   ;;  %vm1256_vm6 = vcmask 261120   ;;  %vm1261_vm7 = vcmask 392192  }
  0x2c   :  { %vm1721_vm3 = vcmp.eq.s32.totalorder %v152_v22, %v155_v23  ;;  %v153_v26 = vadd.s32 8, %v152_v22  ;;  %s1650_s4 = smov 96   ;;  %s1651_s5 = smov 80  }
  0x2d   :  { %1360 = vmatprep.mubr.msk.bf16.mxu0 %vm95_vm0, %v61_v5  ;;  %s1652_s6 = smov 56   ;;  %s1653_s7 = smov 48  }
  0x2e   :  { %1355 = vmatpush3.bf16.msra.mxu0 %v1481_v1  ;;  %vm1728_vm5 = vcmp.eq.s32.totalorder %v153_v26, %v155_v23  ;;  %s1654_s8 = smov 24   ;;  %s1655_s9 = smov 32  }
  0x2f   :  { %1356 = vmatprep.subr.bf16.mxu0 %v1482_v2  ;;  %s1656_s10 = smov 16   ;;  %s1657_s11 = smov [#allocation8]  }
  0x30   :  { %s1279_s12 = sshll.u32 %s1657_s11, 4  ;;  %s1280_s12 = int_to_ptr.vmem [resolvable:$true] %s1279_s12 }
  0x31   :  { %s1612_s13 = scalar_lea.vmem %s1280_s12, 512  ;;  %p1617_p2 = scmp.lt.s32.totalorder %s1280_s12, %s1280_s12 }
  0x32   :  { %1357 = vmatpush3.bf16.msra.mxu0 %v1482_v2  ;;  %p1613_p1 = scmp.ne.s32.totalorder %s1280_s12, %s1612_s13  ;;  %p1618_p3 = scmp.lt.s32.totalorder %s1612_s13, %s1612_s13 }
  0x33   :  { %1358 = vmatprep.subr.bf16.mxu0 %v1483_v6 }
  0x34   :  { %p1619_p4 = por %p1618_p3, %p1617_p2 }
  0x36   :  { %1359 = vmatpush3.bf16.msra.mxu0 %v1483_v6  ;;  %p1620_p5 = pnand %p1619_p4, %p1613_p1 }
  0x37   :  { %1376 = vmatprep.subr.bf16.mxu0 %v1645_v10 }
  0x39   :  { %1361 = vmatmul.mubr.msk.bf16.vlgmr.msra.gmra.mxu0 %vm95_vm0, %v62_v9 }
  0x3a   :  { %1378 = vmatprep.mubr.msk.bf16.mxu0 %vm1646_vm1, %v1645_v10 }
  0xf9   :  { %v1362_v11 = vpop.f32.mrf.mxu0 }
  0xfb   :  { %v136_v12 = vpop.f32.mrf.mxu0 }
  0xfd   :  { %v1363_v13 = vpop.f32.mrf.mxu0 }
  0xfe   :  { %v1706_v16 = vpack.c.bf16 %v1363_v13, %v1362_v11  ;;  %v158_v13 = vld [vmem:[#allocation7] sm:$0xff] }
  0xff   :  { %v139_v14 = vpop.f32.mrf.mxu0 }
 0x100   :  { %v1703_v15 = vpack.c.bf16 %v139_v14, %v136_v12 }
 0x102   :  { %169 = vrot.lane.b32.xlu0 %v1703_v15, %s1647_s0 }
 0x106   :  { %220 = vrot.lane.b32.xlu0 %v1706_v16, %s1647_s0 }
 0x174   :  { %v170_v17 = vpop.permute.xlu0 %169 }
 0x175   :  { %v176_v18 = vsel %vm171_vm2, %v170_v17, 0  ;;  %v159_v17 = vld [vmem:[#allocation7 + $0x8] sm:$0xff] }
 0x176   :  { %1365 = vmatpush3.bf16.xpose.msra.mxu1 %v176_v18 }
 0x177   :  { %1370 = vmatprep.subr.bf16.mxu1 %v1645_v10 }
 0x178   :  { %v221_v19 = vpop.permute.xlu0 %220 }
 0x179   :  { %v226_v20 = vsel %vm171_vm2, %v221_v19, 0 }
 0x17d   :  { %1367 = vmatmul.mubr.msk.bf16.vlgmr.msra.gmra.mxu1 %vm171_vm2, %v1703_v15 }
 0x17e   :  { %1371 = vmatpush3.bf16.xpose.msra.mxu1 %v226_v20  ;;  %1372 = vmatprep.mubr.msk.bf16.mxu1 %vm1646_vm1, %v1645_v10 }
 0x17f   :  { %1382 = vmatprep.subr.bf16.mxu1 %v1645_v10 }
 0x185   :  { %1373 = vmatmul.mubr.msk.bf16.vlgmr.msra.gmra.mxu1 %vm171_vm2, %v1706_v16 }
 0x186   :  { %1384 = vmatprep.mubr.msk.bf16.mxu1 %vm1646_vm1, %v1645_v10 }
 0x23d   :  { %v212_v24 = vpop.f32.mrf.mxu1 }
 0x23e   :  { %v269_v27 = vmul.f32 0.35355338, %v212_v24 }
 0x23f   :  { %v1368_v28 = vpop.f32.mrf.mxu1 }
 0x240   :  { %v277_v29 = vsel %vm1721_vm3, 0.0, %v269_v27 }
 0x241   :  { %v215_v30 = vpop.f32.mrf.mxu1  ;;  %v282_v31 = vsel %vm281_vm4, %v277_v29, -inf }
 0x242   :  { %v270_v33 = vmul.f32 0.35355338, %v215_v30  ;;  %283 = vmax.xlane.f32.xlu1 %v282_v31 }
 0x243   :  { %v1369_v34 = vpop.f32.mrf.mxu1 }
 0x244   :  { %v278_v35 = vsel %vm1728_vm5, 0.0, %v270_v33 }
 0x245   :  { %v262_v36 = vpop.f32.mrf.mxu1  ;;  %v285_v37 = vsel %vm281_vm4, %v278_v35, -inf }
 0x246   :  { %v271_v38 = vmul.f32 0.35355338, %v262_v36  ;;  %286 = vmax.xlane.f32.xlu1 %v285_v37 }
 0x247   :  { %v1374_v39 = vpop.f32.mrf.mxu1 }
 0x248   :  { %v279_v40 = vsel %vm1721_vm3, 0.0, %v271_v38 }
 0x249   :  { %v265_v41 = vpop.f32.mrf.mxu1  ;;  %v288_v42 = vsel %vm281_vm4, %v279_v40, -inf }
 0x24a   :  { %v272_v43 = vmul.f32 0.35355338, %v265_v41  ;;  %289 = vmax.xlane.f32.xlu0 %v288_v42 }
 0x24b   :  { %v1375_v44 = vpop.f32.mrf.mxu1 }
 0x24c   :  { %v280_v45 = vsel %vm1728_vm5, 0.0, %v272_v43 }
 0x24d   :  { %v291_v46 = vsel %vm281_vm4, %v280_v45, -inf }
 0x24e   :  { %292 = vmax.xlane.f32.xlu1 %v291_v46 }
 0x25f   :  { %336 = vrot.lane.b32.xlu1 %v1703_v15, %s1648_s2 }
 0x260   :  { %383 = vrot.lane.b32.xlu0 %v1706_v16, %s1648_s2 }
 0x263   :  { %432 = vrot.lane.b32.xlu1 %v1703_v15, %s1649_s30 }
 0x2cb   :  { %v284_v47 = vpop.xlane.xlu1 %283 }
 0x2cc   :  { %v294_v48 = vsub.f32 %v277_v29, %v284_v47 }
 0x2ce   :  { %v298_v49 = vmul.f32 1.442695, %v294_v48 }
 0x2cf   :  { %v287_v50 = vpop.xlane.xlu1 %286 }
 0x2d0   :  { %1484 = vpow2.f32 %v298_v49  ;;  %v295_v51 = vsub.f32 %v278_v35, %v287_v50 }
 0x2d2   :  { %v300_v52 = vmul.f32 1.442695, %v295_v51 }
 0x2d3   :  { %v290_v53 = vpop.xlane.xlu0 %289 }
 0x2d4   :  { %1486 = vpow2.f32 %v300_v52  ;;  %v296_v54 = vsub.f32 %v279_v40, %v290_v53 }
 0x2d6   :  { %v302_v55 = vmul.f32 1.442695, %v296_v54 }
 0x2d7   :  { %v384_v56 = vpop.permute.xlu0 %383  ;;  %v293_v57 = vpop.xlane.xlu1 %292 }
 0x2d8   :  { %1488 = vpow2.f32 %v302_v55  ;;  %v297_v58 = vsub.f32 %v280_v45, %v293_v57  ;;  %1383 = vmatpush3.bf16.msra.mxu1 %v384_v56 }
 0x2d9   :  { %1394 = vmatprep.subr.bf16.mxu1 %v1645_v10 }
 0x2da   :  { %v304_v59 = vmul.f32 1.442695, %v297_v58 }
 0x2db   :  { %v337_v60 = vpop.permute.xlu1 %336 }
 0x2dc   :  { %1490 = vpow2.f32 %v304_v59  ;;  %1377 = vmatpush3.bf16.msra.mxu0 %v337_v60 }
 0x2dd   :  { %v1485_v61 = vpop.eup %1484  ;;  %1388 = vmatprep.subr.bf16.mxu0 %v1645_v10 }
 0x2de   :  { %v306_v62 = vsel %vm281_vm4, %v1485_v61, 0.0 }
 0x2df   :  { %307 = vadd.xlane.f32.xlu1 %v306_v62  ;;  %v433_v5 = vpop.permute.xlu1 %432 }
 0x2e0   :  { %v438_v28 = vsel %vm171_vm2, %v433_v5, 0 }
 0x2e1   :  { %v1487_v63 = vpop.eup %1486 }
 0x2e2   :  { %v309_v0 = vsel %vm281_vm4, %v1487_v63, 0.0 }
 0x2e3   :  { %310 = vadd.xlane.f32.xlu1 %v309_v0 }
 0x2e5   :  { %v1489_v1 = vpop.eup %1488 }
 0x2e6   :  { %v312_v2 = vsel %vm281_vm4, %v1489_v1, 0.0 }
 0x2e7   :  { %313 = vadd.xlane.f32.xlu1 %v312_v2 }
 0x2e9   :  { %v1491_v3 = vpop.eup %1490 }
 0x2ea   :  { %v315_v4 = vsel %vm281_vm4, %v1491_v3, 0.0 }
 0x2eb   :  { %316 = vadd.xlane.f32.xlu1 %v315_v4 }
 0x2fc   :  { %483 = vrot.lane.b32.xlu1 %v1706_v16, %s1649_s30 }
 0x300   :  { %430 = vrot.lane.b32.xlu1 %v1703_v15, %s1650_s4 }
 0x304   :  { %481 = vrot.lane.b32.xlu1 %v1706_v16, %s1650_s4 }
 0x368   :  { %v308_v6 = vpop.xlane.xlu1 %307 }
 0x369   :  { %1492 = vrcp.f32 %v308_v6 }
 0x36c   :  { %v311_v7 = vpop.xlane.xlu1 %310 }
 0x36d   :  { %1494 = vrcp.f32 %v311_v7 }
 0x370   :  { %v314_v8 = vpop.xlane.xlu1 %313 }
 0x371   :  { %1496 = vrcp.f32 %v314_v8 }
 0x374   :  { %v317_v9 = vpop.xlane.xlu1 %316 }
 0x375   :  { %1498 = vrcp.f32 %v317_v9 }
 0x376   :  { %v1493_v11 = vpop.eup %1492 }
 0x377   :  { %v322_v12 = vmul.f32 %v1493_v11, %v1485_v61 }
 0x378   :  { %v484_v30 = vpop.permute.xlu1 %483 }
 0x379   :  { %v326_v19 = vadd.f32 %v322_v12, %v158_v13  ;;  %v489_v38 = vsel %vm171_vm2, %v484_v30, 0 }
 0x37a   :  { %v1495_v14 = vpop.eup %1494 }
 0x37b   :  { %v323_v18 = vmul.f32 %v1495_v14, %v1487_v63  ;;  %v330_v23 = vsel %vm1721_vm3, 0.0, %v326_v19 }
 0x37c   :  { %v431_v37 = vpop.permute.xlu1 %430 }
 0x37d   :  { %v327_v20 = vadd.f32 %v323_v18, %v159_v17 }
 0x37e   :  { %v1497_v21 = vpop.eup %1496 }
 0x37f   :  { %v324_v22 = vmul.f32 %v1497_v21, %v1489_v1  ;;  %v331_v24 = vsel %vm1728_vm5, 0.0, %v327_v20 }
 0x380   :  { %v334_v26 = vpack.c.bf16 %v331_v24, %v330_v23  ;;  %v482_v39 = vpop.permute.xlu1 %481 }
 0x381   :  { %v328_v31 = vadd.f32 %v324_v22, %v158_v13 }
 0x382   :  { %v1499_v27 = vpop.eup %1498  ;;  %1379 = vmatmul.mubr.msk.bf16.vlgmr.msra.gmra.mxu0 %vm281_vm4, %v334_v26 }
 0x383   :  { %v325_v29 = vmul.f32 %v1499_v27, %v1491_v3  ;;  %1389 = vmatpush3.bf16.xpose.msra.mxu0 %v438_v28  ;;  %1390 = vmatprep.mubr.msk.bf16.mxu0 %vm1646_vm1, %v1645_v10  ;;  %v332_v34 = vsel %vm1721_vm3, 0.0, %v328_v31 }
 0x384   :  { %1400 = vmatprep.subr.bf16.mxu0 %v1645_v10 }
 0x385   :  { %v329_v33 = vadd.f32 %v325_v29, %v159_v17 }
 0x387   :  { %v333_v35 = vsel %vm1728_vm5, 0.0, %v329_v33 }
 0x388   :  { %v335_v36 = vpack.c.bf16 %v333_v35, %v332_v34 }
 0x38a   :  { %1385 = vmatmul.mubr.msk.bf16.vlgmr.msra.gmra.mxu1 %vm281_vm4, %v335_v36  ;;  %1391 = vmatmul.mubr.msk.bf16.vlgmr.msra.gmra.mxu0 %vm171_vm2, %v431_v37  ;;  %v160_v37 = vld [vmem:[#allocation7 + $0x10] sm:$0xff] }
 0x38b   :  { %1395 = vmatpush3.bf16.xpose.msra.mxu1 %v489_v38  ;;  %1396 = vmatprep.mubr.msk.bf16.mxu1 %vm1646_vm1, %v1645_v10 }
 0x38c   :  { %1406 = vmatprep.subr.bf16.mxu1 %v1645_v10  ;;  %1402 = vmatprep.mubr.msk.bf16.mxu0 %vm1646_vm1, %v1645_v10 }
 0x392   :  { %1397 = vmatmul.mubr.msk.bf16.vlgmr.msra.gmra.mxu1 %vm171_vm2, %v482_v39  ;;  %v161_v39 = vld [vmem:[#allocation7 + $0x18] sm:$0xff] }
 0x393   :  { %1408 = vmatprep.mubr.msk.bf16.mxu1 %vm1646_vm1, %v1645_v10 }
 0x442   :  { %v1779_v40 = vpop.f32.mrf.mxu0 }
 0x444   :  { %v1380_v41 = vpop.f32.mrf.mxu0 }
 0x446   :  { %v1781_v42 = vpop.f32.mrf.mxu0 }
 0x448   :  { %v1381_v43 = vpop.f32.mrf.mxu0 }
 0x44a   :  { %v1783_v44 = vpop.f32.mrf.mxu1  ;;  %v474_v45 = vpop.f32.mrf.mxu0 }
 0x44b   :  { %v532_v46 = vmul.f32 0.35355338, %v474_v45 }
 0x44c   :  { %v1386_v47 = vpop.f32.mrf.mxu1  ;;  %v1392_v48 = vpop.f32.mrf.mxu0 }
 0x44d   :  { %v536_v49 = vsel %vm1721_vm3, 0.0, %v532_v46 }
 0x44e   :  { %v1787_v50 = vpop.f32.mrf.mxu1  ;;  %v477_v51 = vpop.f32.mrf.mxu0  ;;  %v540_v52 = vsel %vm281_vm4, %v536_v49, -inf }
 0x44f   :  { %v533_v53 = vmul.f32 0.35355338, %v477_v51  ;;  %541 = vmax.xlane.f32.xlu0 %v540_v52 }
 0x450   :  { %v1387_v54 = vpop.f32.mrf.mxu1  ;;  %v1393_v55 = vpop.f32.mrf.mxu0 }
 0x451   :  { %v537_v56 = vsel %vm1728_vm5, 0.0, %v533_v53 }
 0x452   :  { %v525_v57 = vpop.f32.mrf.mxu1  ;;  %v543_v58 = vsel %vm281_vm4, %v537_v56, -inf }
 0x453   :  { %v534_v59 = vmul.f32 0.35355338, %v525_v57  ;;  %544 = vmax.xlane.f32.xlu1 %v543_v58 }
 0x454   :  { %v1398_v60 = vpop.f32.mrf.mxu1 }
 0x455   :  { %v538_v61 = vsel %vm1721_vm3, 0.0, %v534_v59 }
 0x456   :  { %v528_v62 = vpop.f32.mrf.mxu1  ;;  %v546_v63 = vsel %vm281_vm4, %v538_v61, -inf }
 0x457   :  { %v535_v0 = vmul.f32 0.35355338, %v528_v62  ;;  %547 = vmax.xlane.f32.xlu0 %v546_v63 }
 0x458   :  { %v1399_v1 = vpop.f32.mrf.mxu1 }
 0x459   :  { %v539_v2 = vsel %vm1728_vm5, 0.0, %v535_v0 }
 0x45a   :  { %v549_v3 = vsel %vm281_vm4, %v539_v2, -inf }
 0x45b   :  { %550 = vmax.xlane.f32.xlu0 %v549_v3 }
 0x464   :  { %594 = vrot.lane.b32.xlu1 %v1703_v15, %s1651_s5 }
 0x4d8   :  { %v542_v4 = vpop.xlane.xlu0 %541 }
 0x4d9   :  { %v552_v5 = vsub.f32 %v536_v49, %v542_v4 }
 0x4db   :  { %v556_v6 = vmul.f32 1.442695, %v552_v5 }
 0x4dc   :  { %v545_v7 = vpop.xlane.xlu1 %544 }
 0x4dd   :  { %1500 = vpow2.f32 %v556_v6  ;;  %v553_v8 = vsub.f32 %v537_v56, %v545_v7 }
 0x4df   :  { %v558_v9 = vmul.f32 1.442695, %v553_v8 }
 0x4e0   :  { %v595_v11 = vpop.permute.xlu1 %594  ;;  %v548_v12 = vpop.xlane.xlu0 %547 }
 0x4e1   :  { %1502 = vpow2.f32 %v558_v9  ;;  %v554_v13 = vsub.f32 %v538_v61, %v548_v12  ;;  %1401 = vmatpush3.bf16.msra.mxu0 %v595_v11 }
 0x4e2   :  { %1412 = vmatprep.subr.bf16.mxu0 %v1645_v10 }
 0x4e3   :  { %v560_v14 = vmul.f32 1.442695, %v554_v13 }
 0x4e4   :  { %v551_v17 = vpop.xlane.xlu0 %550 }
 0x4e5   :  { %1504 = vpow2.f32 %v560_v14  ;;  %v555_v18 = vsub.f32 %v539_v2, %v551_v17 }
 0x4e7   :  { %v562_v19 = vmul.f32 1.442695, %v555_v18 }
 0x4e9   :  { %1506 = vpow2.f32 %v562_v19 }
 0x4ea   :  { %v1501_v20 = vpop.eup %1500 }
 0x4eb   :  { %v564_v21 = vsel %vm281_vm4, %v1501_v20, 0.0 }
 0x4ec   :  { %565 = vadd.xlane.f32.xlu1 %v564_v21 }
 0x4ee   :  { %v1503_v22 = vpop.eup %1502 }
 0x4ef   :  { %v567_v23 = vsel %vm281_vm4, %v1503_v22, 0.0 }
 0x4f0   :  { %568 = vadd.xlane.f32.xlu0 %v567_v23 }
 0x4f2   :  { %v1505_v24 = vpop.eup %1504 }
 0x4f3   :  { %v570_v26 = vsel %vm281_vm4, %v1505_v24, 0.0 }
 0x4f4   :  { %571 = vadd.xlane.f32.xlu1 %v570_v26 }
 0x4f6   :  { %v1507_v27 = vpop.eup %1506 }
 0x4f7   :  { %v573_v28 = vsel %vm281_vm4, %v1507_v27, 0.0 }
 0x4f8   :  { %574 = vadd.xlane.f32.xlu0 %v573_v28 }
 0x505   :  { %690 = vrot.lane.b32.xlu1 %v1703_v15, %s1652_s6 }
 0x509   :  { %741 = vrot.lane.b32.xlu1 %v1706_v16, %s1652_s6 }
 0x50d   :  { %739 = vrot.lane.b32.xlu1 %v1706_v16, %s1639_s15 }
 0x50e   :  { %641 = vrot.lane.b32.xlu0 %v1706_v16, %s1651_s5 }
 0x512   :  { %688 = vrot.lane.b32.xlu0 %v1703_v15, %s1639_s15 }
 0x575   :  { %v566_v29 = vpop.xlane.xlu1 %565 }
 0x576   :  { %1508 = vrcp.f32 %v566_v29 }
 0x579   :  { %v569_v30 = vpop.xlane.xlu0 %568 }
 0x57a   :  { %1510 = vrcp.f32 %v569_v30 }
 0x57d   :  { %v572_v31 = vpop.xlane.xlu1 %571 }
 0x57e   :  { %1512 = vrcp.f32 %v572_v31 }
 0x581   :  { %v575_v33 = vpop.xlane.xlu0 %574  ;;  %v691_v48 = vpop.permute.xlu1 %690 }
 0x582   :  { %1514 = vrcp.f32 %v575_v33  ;;  %v696_v54 = vsel %vm171_vm2, %v691_v48, 0 }
 0x583   :  { %v1509_v34 = vpop.eup %1508 }
 0x584   :  { %v580_v35 = vmul.f32 %v1509_v34, %v1501_v20 }
 0x585   :  { %v642_v36 = vpop.permute.xlu0 %641  ;;  %v742_v58 = vpop.permute.xlu1 %741 }
 0x586   :  { %1407 = vmatpush3.bf16.msra.mxu1 %v642_v36  ;;  %v584_v43 = vadd.f32 %v580_v35, %v160_v37  ;;  %v747_v63 = vsel %vm171_vm2, %v742_v58, 0 }
 0x587   :  { %v1511_v38 = vpop.eup %1510  ;;  %1418 = vmatprep.subr.bf16.mxu1 %v1645_v10 }
 0x588   :  { %v581_v41 = vmul.f32 %v1511_v38, %v1503_v22  ;;  %v588_v49 = vsel %vm1721_vm3, 0.0, %v584_v43 }
 0x589   :  { %v689_v62 = vpop.permute.xlu0 %688  ;;  %v740_v0 = vpop.permute.xlu1 %739 }
 0x58a   :  { %v585_v45 = vadd.f32 %v581_v41, %v161_v39 }
 0x58b   :  { %v1513_v46 = vpop.eup %1512 }
 0x58c   :  { %v582_v47 = vmul.f32 %v1513_v46, %v1505_v24  ;;  %v589_v51 = vsel %vm1728_vm5, 0.0, %v585_v45 }
 0x58d   :  { %v592_v52 = vpack.c.bf16 %v589_v51, %v588_v49 }
 0x58e   :  { %v586_v56 = vadd.f32 %v582_v47, %v160_v37 }
 0x58f   :  { %v1515_v53 = vpop.eup %1514  ;;  %1403 = vmatmul.mubr.msk.bf16.vlgmr.msra.gmra.mxu0 %vm281_vm4, %v592_v52 }
 0x590   :  { %v583_v55 = vmul.f32 %v1515_v53, %v1507_v27  ;;  %1413 = vmatpush3.bf16.xpose.msra.mxu0 %v696_v54  ;;  %1414 = vmatprep.mubr.msk.bf16.mxu0 %vm1646_vm1, %v1645_v10  ;;  %v590_v59 = vsel %vm1721_vm3, 0.0, %v586_v56 }
 0x591   :  { %1424 = vmatprep.subr.bf16.mxu0 %v1645_v10 }
 0x592   :  { %v587_v57 = vadd.f32 %v583_v55, %v161_v39 }
 0x594   :  { %v591_v60 = vsel %vm1728_vm5, 0.0, %v587_v57 }
 0x595   :  { %v593_v61 = vpack.c.bf16 %v591_v60, %v590_v59 }
 0x597   :  { %1409 = vmatmul.mubr.msk.bf16.vlgmr.msra.gmra.mxu1 %vm281_vm4, %v593_v61  ;;  %1415 = vmatmul.mubr.msk.bf16.vlgmr.msra.gmra.mxu0 %vm171_vm2, %v689_v62 }
 0x598   :  { %1419 = vmatpush3.bf16.xpose.msra.mxu1 %v747_v63  ;;  %1420 = vmatprep.mubr.msk.bf16.mxu1 %vm1646_vm1, %v1645_v10 }
 0x599   :  { %1430 = vmatprep.subr.bf16.mxu1 %v1645_v10  ;;  %1426 = vmatprep.mubr.msk.bf16.mxu0 %vm1646_vm1, %v1645_v10 }
 0x59f   :  { %1421 = vmatmul.mubr.msk.bf16.vlgmr.msra.gmra.mxu1 %vm171_vm2, %v740_v0 }
 0x5a0   :  { %1432 = vmatprep.mubr.msk.bf16.mxu1 %vm1646_vm1, %v1645_v10 }
 0x64f   :  { %v1839_v1 = vpop.f32.mrf.mxu0 }
 0x651   :  { %v1404_v2 = vpop.f32.mrf.mxu0 }
 0x653   :  { %v1841_v3 = vpop.f32.mrf.mxu0 }
 0x655   :  { %v1405_v4 = vpop.f32.mrf.mxu0 }
 0x656   :  { %v162_v4 = vld [vmem:[#allocation7 + $0x20] sm:$0xff] }
 0x657   :  { %v1843_v5 = vpop.f32.mrf.mxu1  ;;  %v732_v6 = vpop.f32.mrf.mxu0 }
 0x658   :  { %v790_v7 = vmul.f32 0.35355338, %v732_v6 }
 0x659   :  { %v1410_v8 = vpop.f32.mrf.mxu1  ;;  %v1416_v9 = vpop.f32.mrf.mxu0 }
 0x65a   :  { %v794_v11 = vsel %vm1721_vm3, 0.0, %v790_v7  ;;  %v163_v7 = vld [vmem:[#allocation7 + $0x28] sm:$0xff] }
 0x65b   :  { %v1847_v12 = vpop.f32.mrf.mxu1  ;;  %v735_v13 = vpop.f32.mrf.mxu0  ;;  %v798_v14 = vsel %vm281_vm4, %v794_v11, -inf }
 0x65c   :  { %v791_v17 = vmul.f32 0.35355338, %v735_v13  ;;  %799 = vmax.xlane.f32.xlu0 %v798_v14 }
 0x65d   :  { %v1411_v18 = vpop.f32.mrf.mxu1  ;;  %v1417_v19 = vpop.f32.mrf.mxu0 }
 0x65e   :  { %v795_v20 = vsel %vm1728_vm5, 0.0, %v791_v17 }
 0x65f   :  { %v783_v21 = vpop.f32.mrf.mxu1  ;;  %v801_v22 = vsel %vm281_vm4, %v795_v20, -inf }
 0x660   :  { %v792_v23 = vmul.f32 0.35355338, %v783_v21  ;;  %802 = vmax.xlane.f32.xlu1 %v801_v22 }
 0x661   :  { %v1422_v24 = vpop.f32.mrf.mxu1 }
 0x662   :  { %v796_v26 = vsel %vm1721_vm3, 0.0, %v792_v23 }
 0x663   :  { %v786_v27 = vpop.f32.mrf.mxu1  ;;  %v804_v28 = vsel %vm281_vm4, %v796_v26, -inf }
 0x664   :  { %v793_v29 = vmul.f32 0.35355338, %v786_v27  ;;  %805 = vmax.xlane.f32.xlu0 %v804_v28 }
 0x665   :  { %v1423_v30 = vpop.f32.mrf.mxu1 }
 0x666   :  { %v797_v31 = vsel %vm1728_vm5, 0.0, %v793_v29 }
 0x667   :  { %v807_v33 = vsel %vm281_vm4, %v797_v31, -inf }
 0x668   :  { %808 = vmax.xlane.f32.xlu0 %v807_v33 }
 0x671   :  { %852 = vrot.lane.b32.xlu1 %v1703_v15, %s1653_s7 }
 0x6e5   :  { %v800_v34 = vpop.xlane.xlu0 %799 }
 0x6e6   :  { %v810_v35 = vsub.f32 %v794_v11, %v800_v34 }
 0x6e8   :  { %v814_v36 = vmul.f32 1.442695, %v810_v35 }
 0x6e9   :  { %v803_v37 = vpop.xlane.xlu1 %802 }
 0x6ea   :  { %1516 = vpow2.f32 %v814_v36  ;;  %v811_v38 = vsub.f32 %v795_v20, %v803_v37 }
 0x6ec   :  { %v816_v39 = vmul.f32 1.442695, %v811_v38 }
 0x6ed   :  { %v853_v41 = vpop.permute.xlu1 %852  ;;  %v806_v43 = vpop.xlane.xlu0 %805 }
 0x6ee   :  { %1518 = vpow2.f32 %v816_v39  ;;  %v812_v45 = vsub.f32 %v796_v26, %v806_v43  ;;  %1425 = vmatpush3.bf16.msra.mxu0 %v853_v41 }
 0x6ef   :  { %1436 = vmatprep.subr.bf16.mxu0 %v1645_v10 }
 0x6f0   :  { %v818_v46 = vmul.f32 1.442695, %v812_v45 }
 0x6f1   :  { %v809_v47 = vpop.xlane.xlu0 %808 }
 0x6f2   :  { %1520 = vpow2.f32 %v818_v46  ;;  %v813_v48 = vsub.f32 %v797_v31, %v809_v47 }
 0x6f4   :  { %v820_v49 = vmul.f32 1.442695, %v813_v48 }
 0x6f6   :  { %1522 = vpow2.f32 %v820_v49 }
 0x6f7   :  { %v1517_v51 = vpop.eup %1516 }
 0x6f8   :  { %v822_v52 = vsel %vm281_vm4, %v1517_v51, 0.0 }
 0x6f9   :  { %823 = vadd.xlane.f32.xlu1 %v822_v52 }
 0x6fb   :  { %v1519_v53 = vpop.eup %1518 }
 0x6fc   :  { %v825_v54 = vsel %vm281_vm4, %v1519_v53, 0.0 }
 0x6fd   :  { %826 = vadd.xlane.f32.xlu0 %v825_v54 }
 0x6ff   :  { %v1521_v55 = vpop.eup %1520 }
 0x700   :  { %v828_v56 = vsel %vm281_vm4, %v1521_v55, 0.0 }
 0x701   :  { %829 = vadd.xlane.f32.xlu1 %v828_v56 }
 0x703   :  { %v1523_v57 = vpop.eup %1522 }
 0x704   :  { %v831_v58 = vsel %vm281_vm4, %v1523_v57, 0.0 }
 0x705   :  { %832 = vadd.xlane.f32.xlu0 %v831_v58 }
 0x712   :  { %948 = vrot.lane.b32.xlu1 %v1703_v15, %s1654_s8 }
 0x716   :  { %999 = vrot.lane.b32.xlu1 %v1706_v16, %s1654_s8 }
 0x71a   :  { %997 = vrot.lane.b32.xlu1 %v1706_v16, %s1655_s9 }
 0x71b   :  { %899 = vrot.lane.b32.xlu0 %v1706_v16, %s1653_s7 }
 0x71f   :  { %946 = vrot.lane.b32.xlu0 %v1703_v15, %s1655_s9 }
 0x782   :  { %v824_v59 = vpop.xlane.xlu1 %823 }
 0x783   :  { %1524 = vrcp.f32 %v824_v59 }
 0x786   :  { %v827_v60 = vpop.xlane.xlu0 %826 }
 0x787   :  { %1526 = vrcp.f32 %v827_v60 }
 0x78a   :  { %v830_v61 = vpop.xlane.xlu1 %829 }
 0x78b   :  { %1528 = vrcp.f32 %v830_v61 }
 0x78e   :  { %v833_v62 = vpop.xlane.xlu0 %832  ;;  %v949_v17 = vpop.permute.xlu1 %948 }
 0x78f   :  { %1530 = vrcp.f32 %v833_v62  ;;  %v954_v22 = vsel %vm171_vm2, %v949_v17, 0 }
 0x790   :  { %v1525_v63 = vpop.eup %1524 }
 0x791   :  { %v838_v0 = vmul.f32 %v1525_v63, %v1517_v51 }
 0x792   :  { %v900_v2 = vpop.permute.xlu0 %899  ;;  %v1000_v27 = vpop.permute.xlu1 %999 }
 0x793   :  { %1431 = vmatpush3.bf16.msra.mxu1 %v900_v2  ;;  %v842_v9 = vadd.f32 %v838_v0, %v162_v4  ;;  %v1005_v33 = vsel %vm171_vm2, %v1000_v27, 0 }
 0x794   :  { %v1527_v6 = vpop.eup %1526  ;;  %1442 = vmatprep.subr.bf16.mxu1 %v1645_v10 }
 0x795   :  { %v839_v8 = vmul.f32 %v1527_v6, %v1519_v53  ;;  %v846_v18 = vsel %vm1721_vm3, 0.0, %v842_v9 }
 0x796   :  { %v947_v31 = vpop.permute.xlu0 %946  ;;  %v998_v34 = vpop.permute.xlu1 %997 }
 0x797   :  { %v843_v11 = vadd.f32 %v839_v8, %v163_v7 }
 0x798   :  { %v1529_v13 = vpop.eup %1528 }
 0x799   :  { %v840_v14 = vmul.f32 %v1529_v13, %v1521_v55  ;;  %v847_v19 = vsel %vm1728_vm5, 0.0, %v843_v11 }
 0x79a   :  { %v850_v20 = vpack.c.bf16 %v847_v19, %v846_v18 }
 0x79b   :  { %v844_v24 = vadd.f32 %v840_v14, %v162_v4 }
 0x79c   :  { %v1531_v21 = vpop.eup %1530  ;;  %1427 = vmatmul.mubr.msk.bf16.vlgmr.msra.gmra.mxu0 %vm281_vm4, %v850_v20 }
 0x79d   :  { %v841_v23 = vmul.f32 %v1531_v21, %v1523_v57  ;;  %1437 = vmatpush3.bf16.xpose.msra.mxu0 %v954_v22  ;;  %1438 = vmatprep.mubr.msk.bf16.mxu0 %vm1646_vm1, %v1645_v10  ;;  %v848_v28 = vsel %vm1721_vm3, 0.0, %v844_v24 }
 0x79e   :  { %1448 = vmatprep.subr.bf16.mxu0 %v1645_v10 }
 0x79f   :  { %v845_v26 = vadd.f32 %v841_v23, %v163_v7 }
 0x7a1   :  { %v849_v29 = vsel %vm1728_vm5, 0.0, %v845_v26 }
 0x7a2   :  { %v851_v30 = vpack.c.bf16 %v849_v29, %v848_v28 }
 0x7a4   :  { %1433 = vmatmul.mubr.msk.bf16.vlgmr.msra.gmra.mxu1 %vm281_vm4, %v851_v30  ;;  %1439 = vmatmul.mubr.msk.bf16.vlgmr.msra.gmra.mxu0 %vm171_vm2, %v947_v31 }
 0x7a5   :  { %1443 = vmatpush3.bf16.xpose.msra.mxu1 %v1005_v33  ;;  %1444 = vmatprep.mubr.msk.bf16.mxu1 %vm1646_vm1, %v1645_v10  ;;  %v164_v33 = vld [vmem:[#allocation7 + $0x30] sm:$0xff] }
 0x7a6   :  { %1454 = vmatprep.subr.bf16.mxu1 %v1645_v10  ;;  %1450 = vmatprep.mubr.msk.bf16.mxu0 %vm1646_vm1, %v1645_v10 }
 0x7ac   :  { %1445 = vmatmul.mubr.msk.bf16.vlgmr.msra.gmra.mxu1 %vm171_vm2, %v998_v34 }
 0x7ad   :  { %1456 = vmatprep.mubr.msk.bf16.mxu1 %vm1646_vm1, %v1645_v10 }
 0x85c   :  { %v1899_v35 = vpop.f32.mrf.mxu0 }
 0x85e   :  { %v1428_v36 = vpop.f32.mrf.mxu0 }
 0x860   :  { %v1901_v37 = vpop.f32.mrf.mxu0 }
 0x862   :  { %v1429_v38 = vpop.f32.mrf.mxu0 }
 0x864   :  { %v1903_v39 = vpop.f32.mrf.mxu1  ;;  %v990_v41 = vpop.f32.mrf.mxu0 }
 0x865   :  { %v1048_v43 = vmul.f32 0.35355338, %v990_v41 }
 0x866   :  { %v1434_v45 = vpop.f32.mrf.mxu1  ;;  %v1440_v46 = vpop.f32.mrf.mxu0 }
 0x867   :  { %v1052_v47 = vsel %vm1721_vm3, 0.0, %v1048_v43 }
 0x868   :  { %v942_v48 = vpop.f32.mrf.mxu1  ;;  %v993_v49 = vpop.f32.mrf.mxu0  ;;  %v1056_v51 = vsel %vm281_vm4, %v1052_v47, -inf }
 0x869   :  { %v1049_v10 = vmul.f32 0.35355338, %v993_v49  ;;  %1057 = vmax.xlane.f32.xlu0 %v1056_v51 }
 0x86a   :  { %v1435_v52 = vpop.f32.mrf.mxu1  ;;  %v1441_v53 = vpop.f32.mrf.mxu0 }
 0x86b   :  { %v1053_v54 = vsel %vm1728_vm5, 0.0, %v1049_v10 }
 0x86c   :  { %v1041_v55 = vpop.f32.mrf.mxu1  ;;  %v1059_v56 = vsel %vm281_vm4, %v1053_v54, -inf }
 0x86d   :  { %v1050_v57 = vmul.f32 0.35355338, %v1041_v55  ;;  %1060 = vmax.xlane.f32.xlu1 %v1059_v56 }
 0x86e   :  { %v1446_v58 = vpop.f32.mrf.mxu1 }
 0x86f   :  { %v1054_v59 = vsel %vm1721_vm3, 0.0, %v1050_v57 }
 0x870   :  { %v1044_v60 = vpop.f32.mrf.mxu1  ;;  %v1062_v61 = vsel %vm281_vm4, %v1054_v59, -inf }
 0x871   :  { %v1051_v62 = vmul.f32 0.35355338, %v1044_v60  ;;  %1063 = vmax.xlane.f32.xlu0 %v1062_v61 }
 0x872   :  { %v1447_v63 = vpop.f32.mrf.mxu1 }
 0x873   :  { %v1055_v0 = vsel %vm1728_vm5, 0.0, %v1051_v62 }
 0x874   :  { %v1065_v2 = vsel %vm281_vm4, %v1055_v0, -inf }
 0x875   :  { %1066 = vmax.xlane.f32.xlu0 %v1065_v2 }
 0x8f2   :  { %v1058_v4 = vpop.xlane.xlu0 %1057 }
 0x8f3   :  { %v1068_v6 = vsub.f32 %v1052_v47, %v1058_v4 }
 0x8f5   :  { %v1072_v7 = vmul.f32 1.442695, %v1068_v6 }
 0x8f6   :  { %v1061_v8 = vpop.xlane.xlu1 %1060 }
 0x8f7   :  { %1532 = vpow2.f32 %v1072_v7  ;;  %v1069_v9 = vsub.f32 %v1053_v54, %v1061_v8 }
 0x8f9   :  { %v1074_v11 = vmul.f32 1.442695, %v1069_v9 }
 0x8fa   :  { %v1064_v13 = vpop.xlane.xlu0 %1063 }
 0x8fb   :  { %1534 = vpow2.f32 %v1074_v11  ;;  %v1070_v14 = vsub.f32 %v1054_v59, %v1064_v13  ;;  %v1548_v13 = vld [vmem:[#allocation2] sm:$0xff] }
 0x8fd   :  { %v1076_v17 = vmul.f32 1.442695, %v1070_v14 }
 0x8fe   :  { %v1067_v18 = vpop.xlane.xlu0 %1066 }
 0x8ff   :  { %1536 = vpow2.f32 %v1076_v17  ;;  %v1071_v19 = vsub.f32 %v1055_v0, %v1067_v18 }
 0x901   :  { %v1078_v20 = vmul.f32 1.442695, %v1071_v19 }
 0x903   :  { %1538 = vpow2.f32 %v1078_v20 }
 0x904   :  { %v1533_v21 = vpop.eup %1532 }
 0x905   :  { %v1080_v22 = vsel %vm281_vm4, %v1533_v21, 0.0 }
 0x906   :  { %1081 = vadd.xlane.f32.xlu1 %v1080_v22 }
 0x908   :  { %v1535_v23 = vpop.eup %1534 }
 0x909   :  { %v1083_v24 = vsel %vm281_vm4, %v1535_v23, 0.0 }
 0x90a   :  { %1084 = vadd.xlane.f32.xlu0 %v1083_v24 }
 0x90c   :  { %v1537_v26 = vpop.eup %1536 }
 0x90d   :  { %v1086_v27 = vsel %vm281_vm4, %v1537_v26, 0.0 }
 0x90e   :  { %1087 = vadd.xlane.f32.xlu1 %v1086_v27 }
 0x910   :  { %v1539_v28 = vpop.eup %1538 }
 0x911   :  { %v1089_v29 = vsel %vm281_vm4, %v1539_v28, 0.0 }
 0x912   :  { %1090 = vadd.xlane.f32.xlu0 %v1089_v29 }
 0x91f   :  { %1110 = vrot.lane.b32.xlu1 %v1703_v15, %s1656_s10 }
 0x923   :  { %1208 = vrot.lane.b32.xlu1 %v1839_v1, %s1656_s10 }
 0x927   :  { %1210 = vrot.lane.b32.xlu1 %v1841_v3, %s1656_s10 }
 0x928   :  { %1157 = vrot.lane.b32.xlu0 %v1706_v16, %s1656_s10 }
 0x92b   :  { %1214 = vrot.lane.b32.xlu1 %v1847_v12, %s1656_s10 }
 0x92c   :  { %1212 = vrot.lane.b32.xlu0 %v1843_v5, %s1656_s10 }
 0x92f   :  { %1226 = vrot.lane.b32.xlu1 %v1901_v37, %s1655_s9 }
 0x930   :  { %1224 = vrot.lane.b32.xlu0 %v1899_v35, %s1655_s9  ;;  %v165_v35 = vld [vmem:[#allocation7 + $0x38] sm:$0xff] }
 0x933   :  { %1230 = vrot.lane.b32.xlu1 %v942_v48, %s1655_s9 }
 0x934   :  { %1228 = vrot.lane.b32.xlu0 %v1903_v39, %s1655_s9 }
 0x98f   :  { %v1082_v15 = vpop.xlane.xlu1 %1081 }
 0x990   :  { %1540 = vrcp.f32 %v1082_v15 }
 0x993   :  { %v1085_v1 = vpop.xlane.xlu0 %1084 }
 0x994   :  { %1542 = vrcp.f32 %v1085_v1  ;;  %v1551_v1 = vld [vmem:[#allocation2 + $0x18] sm:$0xff] }
 0x997   :  { %v1088_v16 = vpop.xlane.xlu1 %1087 }
 0x998   :  { %1544 = vrcp.f32 %v1088_v16 }
 0x99b   :  { %v1111_v3 = vpop.permute.xlu1 %1110  ;;  %v1091_v12 = vpop.xlane.xlu0 %1090 }
 0x99c   :  { %1546 = vrcp.f32 %v1091_v12  ;;  %1449 = vmatpush3.bf16.msra.mxu0 %v1111_v3 }
 0x99d   :  { %v1541_v5 = vpop.eup %1540 }
 0x99e   :  { %v1096_v30 = vmul.f32 %v1541_v5, %v1533_v21  ;;  %v1549_v21 = vld [vmem:[#allocation2 + $0x8] sm:$0xff] }
 0x99f   :  { %v1158_v31 = vpop.permute.xlu0 %1157  ;;  %v1209_v60 = vpop.permute.xlu1 %1208 }
 0x9a0   :  { %1455 = vmatpush3.bf16.msra.mxu1 %v1158_v31  ;;  %v1100_v37 = vadd.f32 %v1096_v30, %v164_v33  ;;  %v1252_v6 = vsel %vm281_vm4, %v1779_v40, %v1209_v60 }
 0x9a1   :  { %v1543_v34 = vpop.eup %1542 }
 0x9a2   :  { %v1097_v36 = vmul.f32 %v1543_v34, %v1535_v23  ;;  %v1104_v43 = vsel %vm1721_vm3, 0.0, %v1100_v37 }
 0x9a3   :  { %v1211_v61 = vpop.permute.xlu1 %1210  ;;  %v1213_v62 = vpop.permute.xlu0 %1212 }
 0x9a4   :  { %v1101_v38 = vadd.f32 %v1097_v36, %v165_v35  ;;  %v1253_v17 = vsel %vm281_vm4, %v1781_v42, %v1211_v61  ;;  %v1254_v22 = vsel %vm281_vm4, %v1783_v44, %v1213_v62  ;;  %v1550_v42 = vld [vmem:[#allocation2 + $0x10] sm:$0xff] }
 0x9a5   :  { %v1545_v39 = vpop.eup %1544 }
 0x9a6   :  { %v1098_v41 = vmul.f32 %v1545_v39, %v1537_v26  ;;  %v1105_v45 = vsel %vm1728_vm5, 0.0, %v1101_v38 }
 0x9a7   :  { %v1108_v46 = vpack.c.bf16 %v1105_v45, %v1104_v43  ;;  %v1215_v63 = vpop.permute.xlu1 %1214  ;;  %v1225_v0 = vpop.permute.xlu0 %1224 }
 0x9a8   :  { %v1102_v49 = vadd.f32 %v1098_v41, %v164_v33  ;;  %v1257_v7 = vsel %vm1256_vm6, %v1252_v6, %v1225_v0 }
 0x9a9   :  { %v1547_v47 = vpop.eup %1546  ;;  %1451 = vmatmul.mubr.msk.bf16.vlgmr.msra.gmra.mxu0 %vm281_vm4, %v1108_v46 }
 0x9aa   :  { %v1099_v48 = vmul.f32 %v1547_v47, %v1539_v28  ;;  %v1106_v10 = vsel %vm1721_vm3, 0.0, %v1102_v49  ;;  %v1255_v28 = vsel %vm281_vm4, %v1787_v50, %v1215_v63 }
 0x9ab   :  { %v1227_v2 = vpop.permute.xlu1 %1226  ;;  %v1229_v4 = vpop.permute.xlu0 %1228 }
 0x9ac   :  { %v1103_v51 = vadd.f32 %v1099_v48, %v165_v35  ;;  %v1258_v18 = vsel %vm1256_vm6, %v1253_v17, %v1227_v2  ;;  %v1259_v23 = vsel %vm1256_vm6, %v1254_v22, %v1229_v4 }
 0x9ae   :  { %v1107_v52 = vsel %vm1728_vm5, 0.0, %v1103_v51 }
 0x9af   :  { %v1109_v53 = vpack.c.bf16 %v1107_v52, %v1106_v10  ;;  %v1231_v8 = vpop.permute.xlu1 %1230 }
 0x9b0   :  { %v1260_v29 = vsel %vm1256_vm6, %v1255_v28, %v1231_v8 }
 0x9b1   :  { %1457 = vmatmul.mubr.msk.bf16.vlgmr.msra.gmra.mxu1 %vm281_vm4, %v1109_v53 }
 0xa69   :  { %v1150_v54 = vpop.f32.mrf.mxu0 }
 0xa6a   :  { %1240 = vrot.lane.b32.xlu0 %v1150_v54, %s1653_s7 }
 0xa6b   :  { %v1452_v55 = vpop.f32.mrf.mxu0 }
 0xa6d   :  { %v1153_v56 = vpop.f32.mrf.mxu0 }
 0xa6e   :  { %1242 = vrot.lane.b32.xlu1 %v1153_v56, %s1653_s7 }
 0xa6f   :  { %v1453_v57 = vpop.f32.mrf.mxu0 }
 0xa71   :  { %v1197_v58 = vpop.f32.mrf.mxu1 }
 0xa72   :  { %1244 = vrot.lane.b32.xlu0 %v1197_v58, %s1653_s7 }
 0xa73   :  { %v1458_v59 = vpop.f32.mrf.mxu1 }
 0xa75   :  { %v1200_v25 = vpop.f32.mrf.mxu1 }
 0xa76   :  { %1246 = vrot.lane.b32.xlu1 %v1200_v25, %s1653_s7 }
 0xa77   :  { %v1459_v32 = vpop.f32.mrf.mxu1 }
 0xadc   :  { %v1241_v9 = vpop.permute.xlu0 %1240 }
 0xadd   :  { %v1262_v11 = vsel %vm1261_vm7, %v1257_v7, %v1241_v9 }
 0xade   :  { %v1266_v14 = vadd.f32 %v1548_v13, %v1262_v11 }
 0xae0   :  { %1270 = vst.msk [vmem:[#allocation8] sm:$0xff] %vm95_vm0, %v1266_v14  ;;  %v1243_v19 = vpop.permute.xlu1 %1242 }
 0xae1   :  { %v1263_v20 = vsel %vm1261_vm7, %v1258_v18, %v1243_v19 }
 0xae2   :  { %v1267_v40 = vadd.f32 %v1549_v21, %v1263_v20 }
 0xae4   :  { %1271 = vst.msk [vmem:[#allocation8 + $0x8] sm:$0xff] %vm95_vm0, %v1267_v40  ;;  %v1245_v24 = vpop.permute.xlu0 %1244 }
 0xae5   :  { %v1264_v26 = vsel %vm1261_vm7, %v1259_v23, %v1245_v24 }
 0xae6   :  { %v1268_v27 = vadd.f32 %v1550_v42, %v1264_v26 }
 0xae8   :  { %1272 = vst.msk [vmem:[#allocation8 + $0x10] sm:$0xff] %vm95_vm0, %v1268_v27  ;;  %v1247_v15 = vpop.permute.xlu1 %1246 }
 0xae9   :  { %v1265_v44 = vsel %vm1261_vm7, %v1260_v29, %v1247_v15 }
 0xaea   :  { %v1269_v16 = vadd.f32 %v1551_v1, %v1265_v44 }
 0xaec   :  { %1273 = vst.msk [vmem:[#allocation8 + $0x18] sm:$0xff] %vm95_vm0, %v1269_v16 }
 0xaed   :  { %1623 = shalt.err (!%p1620_p5)
}
 0xaee   :  { %1285 = dma.vmem_to_hbm [thread:$0]  %s1280_s12, 512, %s1977_s3, [#allocation4], %s1642_s22, %s1642_s22, %s1643_s23  }
 0xaef   :  { %1636 = dma.done.wait [#allocation4], 512  }
 0xaf0   :  { %1637 = vsyncadd [#allocation4], 4294966784 }
 0xaf1   :  { %1289 = vsyncpa [#allocation3], 1 }
 0xaf2   :  { %1290 = vsyncpa [#allocation6], 1 }
 0xaf3   :  { %1291 = vsyncpa [#allocation4], 1 }

</bundles_post_ra>
